<compile_context>
chip_gen: v6e
topology: v6e:2x2x1
jax: 0.10.0
libtpu: 0.0.40
codegen_flags: <defaults>
</compile_context>

<pallas_src>
import functools

import jax
import jax.numpy as jnp
from jax.experimental import pallas as pl
from jax.experimental.pallas import tpu as pltpu


def _rmsnorm_kernel(x_ref, w_ref, o_ref, *, eps, input_dtype):
    """One row-tile of RMSNorm.

    x_ref : (TR, H)  input rows (any float dtype)
    w_ref : (1,  H)  f32 weight (broadcast over rows)
    o_ref : (TR, H)  output rows
    """
    x32 = x_ref[...].astype(jnp.float32)                       # (TR, H) f32
    var = jnp.mean(x32 * x32, axis=-1, keepdims=True)          # (TR, 1) f32
    inv = jax.lax.rsqrt(var + eps)                              # EUP slot
    normed = (x32 * inv).astype(input_dtype)                    # cast like torch
    o_ref[...] = (w_ref[...] * normed).astype(o_ref.dtype)


class LlamaRMSNorm:
    """JAX/Pallas equivalent of the PyTorch LlamaRMSNorm forward pass."""

    def __init__(self, hidden_size, eps=1e-6):
        self.hidden_size = hidden_size
        self.variance_epsilon = float(eps)
        # nn.Parameter(torch.ones(hidden_size)) -> f32 ones
        self.weight = jnp.ones((hidden_size,), dtype=jnp.float32)

    def __call__(self, hidden_states):
        input_dtype = hidden_states.dtype
        orig_shape = hidden_states.shape
        H = self.hidden_size
        assert orig_shape[-1] == H, "last dim must equal hidden_size"

        # Flatten all leading dims into a single row axis.
        rows = 1
        for d in orig_shape[:-1]:
            rows *= int(d)
        x2d = hidden_states.reshape(rows, H)
        w2d = self.weight.reshape(1, H)

        # torch: f32 weight * input_dtype activations -> promoted dtype.
        out_dtype = jnp.result_type(self.weight.dtype, input_dtype)

        # Row-tile: multiple of 8 (sublane), capped so the f32 working set per
        # tile (x32 + normed + out, double-buffered in/out) stays a few MiB at
        # most even for large hidden sizes.  Fits comfortably on v5e/v6e/v7x.
        if rows >= 8:
            max_rows_by_vmem = max(8, (1 << 21) // (4 * H))      # ~2 MiB f32 / tile
            tr = min(rows - (rows % 8) if rows % 8 else rows, 1024, max_rows_by_vmem)
            tr -= tr % 8
            tr = max(tr, 8)
        else:
            tr = rows                                            # full extent (tiny case)

        grid = (pl.cdiv(rows, tr),)

        kernel = functools.partial(
            _rmsnorm_kernel, eps=self.variance_epsilon, input_dtype=input_dtype
        )

        out2d = pl.pallas_call(
            kernel,
            out_shape=jax.ShapeDtypeStruct((rows, H), out_dtype),
            grid=grid,
            in_specs=[
                pl.BlockSpec((tr, H), lambda i: (i, 0)),   # activations: tiled over rows
                pl.BlockSpec((1, H), lambda i: (0, 0)),    # weight: resident, reused
            ],
            out_specs=pl.BlockSpec((tr, H), lambda i: (i, 0)),
            compiler_params=pltpu.CompilerParams(
                dimension_semantics=("parallel",),         # shard rows across TCs (v7x)
                vmem_limit_bytes=64 << 20,
            ),
        )(x2d, w2d)

        return out2d.reshape(orig_shape[:-1] + (H,)).astype(out_dtype)


def _reference(x, weight, eps):
    input_dtype = x.dtype
    x32 = x.astype(jnp.float32)
    var = jnp.mean(x32 * x32, axis=-1, keepdims=True)
    y = x32 * jax.lax.rsqrt(var + eps)
    return weight * y.astype(input_dtype)


if __name__ == "__main__":
    # Small shapes consistent with the module: (batch=2, heads=4, seq=8, hidden=32)
    hidden = 32
    key = jax.random.PRNGKey(0)
    x = jax.random.normal(key, (2, 4, 8, hidden), dtype=jnp.float32)

    norm = LlamaRMSNorm(hidden_size=hidden, eps=1e-6)
    out = norm(x)
    out = jax.block_until_ready(out)

    assert out.shape == x.shape, out.shape

    ref = _reference(x, norm.weight, norm.variance_epsilon)
    assert out.dtype == ref.dtype, (out.dtype, ref.dtype)
    assert jnp.allclose(out, ref, atol=1e-5, rtol=1e-5), float(
        jnp.max(jnp.abs(out - ref))
    )

    print("KERNEL_OK")
</pallas_src>

<mosaic_0001>
module attributes {stable_mosaic.version = 11 : i64} {
  func.func @_rmsnorm_kernel(%arg0: i32, %arg1: memref<64x32xf32, #tpu.memory_space<vmem>>, %arg2: memref<1x32xf32, #tpu.memory_space<vmem>>, %arg3: memref<64x32xf32, #tpu.memory_space<vmem>>) attributes {dimension_semantics = [#tpu.dimension_semantics<parallel>], iteration_bounds = array<i64: 1>, scalar_prefetch = 0 : i64, scratch_operands = 0 : i64, tpu.core_type = #tpu.core_type<tc>, window_params = [{transform_indices = @transform_0, window_bounds = array<i64: 64, 32>}, {pipeline_mode = #tpu.pipeline_mode<synchronous>, transform_indices = @transform_1, window_bounds = array<i64: 1, 32>}, {transform_indices = @transform_2, window_bounds = array<i64: 64, 32>}]} {
    %c0 = arith.constant 0 : index
    %c0_0 = arith.constant 0 : index
    %0 = vector.load %arg1[%c0, %c0_0] : memref<64x32xf32, #tpu.memory_space<vmem>>, vector<64x32xf32>
    %1 = arith.mulf %0, %0 : vector<64x32xf32>
    %cst = arith.constant dense<0.000000e+00> : vector<64xf32>
    %2 = vector.multi_reduction <add>, %1, %cst [1] : vector<64x32xf32> to vector<64xf32>
    %3 = vector.shape_cast %2 : vector<64xf32> to vector<64x1xf32>
    %cst_1 = arith.constant 3.200000e+01 : f32
    %4 = vector.broadcast %cst_1 : f32 to vector<64x1xf32>
    %5 = arith.divf %3, %4 : vector<64x1xf32>
    %cst_2 = arith.constant 9.99999997E-7 : f32
    %6 = vector.broadcast %cst_2 : f32 to vector<64x1xf32>
    %7 = arith.addf %5, %6 : vector<64x1xf32>
    %8 = math.rsqrt %7 : vector<64x1xf32>
    %9 = vector.broadcast %8 : vector<64x1xf32> to vector<64x32xf32>
    %10 = arith.mulf %0, %9 : vector<64x32xf32>
    %c0_3 = arith.constant 0 : index
    %c0_4 = arith.constant 0 : index
    %11 = vector.load %arg2[%c0_3, %c0_4] : memref<1x32xf32, #tpu.memory_space<vmem>>, vector<1x32xf32>
    %12 = vector.broadcast %11 : vector<1x32xf32> to vector<64x32xf32>
    %13 = arith.mulf %12, %10 : vector<64x32xf32>
    %c0_5 = arith.constant 0 : index
    %c0_6 = arith.constant 0 : index
    %14 = vector.load %arg3[%c0_5, %c0_6] : memref<64x32xf32, #tpu.memory_space<vmem>>, vector<64x32xf32>
    tpu.vector_store %arg3[%c0_5, %c0_6], %13 {strides = array<i32>} : memref<64x32xf32, #tpu.memory_space<vmem>>, vector<64x32xf32>,
    return
  }
  func.func @transform_0(%arg0: i32) -> (i32, i32) {
    %c0_i32 = arith.constant 0 : i32
    %c0_i32_0 = arith.constant 0 : i32
    return %arg0, %c0_i32 : i32, i32
  }
  func.func @transform_1(%arg0: i32) -> (i32, i32) {
    %c0_i32 = arith.constant 0 : i32
    %c0_i32_0 = arith.constant 0 : i32
    %c0_i32_1 = arith.constant 0 : i32
    return %c0_i32, %c0_i32_0 : i32, i32
  }
  func.func @transform_2(%arg0: i32) -> (i32, i32) {
    %c0_i32 = arith.constant 0 : i32
    %c0_i32_0 = arith.constant 0 : i32
    return %arg0, %c0_i32 : i32, i32
  }
}

</mosaic_0001>

<bundles_post_ra>
// kernel: tpu_custom_call.1
= control target key start
LH: loop header
LB: loop body
LE: loop exit
PB: predicated region body
PF: predicated region fallthrough
CT: control target
= control target key end

     0   :  { %vm27_vm0 = vcmask 261120   ;;  %s251_s0 = inlined_call_operand.vmem [shape: f32[64,32], index: 0, kind: input, shape index: {}]   ;;  %s252_s1 = inlined_call_operand.vmem [shape: f32[1,32], index: 1, kind: input, shape index: {}]   ;;  %s253_s2 = inlined_call_operand.vmem [shape: f32[64,32], index: 2, kind: output, shape index: {}]  }
   0x1   :  { %v147_v0 = vld [vmem:[%s251_s0 + $0x10] sm:$0xff]  ;;  %v152_v1 = vld [vmem:[%s251_s0] sm:$0xff]  ;;  %v157_v2 = vld [vmem:[%s251_s0 + $0x18] sm:$0xff] }
   0x2   :  { %v21_v3 = vmul.f32 %v147_v0, %v147_v0  ;;  %v19_v4 = vmul.f32 %v152_v1, %v152_v1  ;;  %v22_v5 = vmul.f32 %v157_v2, %v157_v2  ;;  %v168_v6 = vld [vmem:[%s251_s0 + $0x8] sm:$0xff]  ;;  %v180_v9 = vld [vmem:[%s251_s0 + $0x20] sm:$0xff]  ;;  %v193_v16 = vld [vmem:[%s251_s0 + $0x38] sm:$0xff] }
   0x3   :  { %v20_v7 = vmul.f32 %v168_v6, %v168_v6  ;;  %v175_v8 = vld [vmem:[%s251_s0 + $0x28] sm:$0xff]  ;;  %v23_v15 = vmul.f32 %v180_v9, %v180_v9  ;;  %v198_v17 = vld [vmem:[%s251_s0 + $0x30] sm:$0xff]  ;;  %v26_v20 = vmul.f32 %v193_v16, %v193_v16  ;;  %v112_v49 = vld [vmem:[%s252_s1] ss:$0 sm:$0xff] }
   0x4   :  { %v34_v10 = vsel %vm27_vm0, %v21_v3, 0.0  ;;  %v28_v11 = vsel %vm27_vm0, %v19_v4, 0.0  ;;  %v37_v12 = vsel %vm27_vm0, %v22_v5, 0.0  ;;  %v24_v14 = vmul.f32 %v175_v8, %v175_v8 }
   0x5   :  { %35 = vadd.xlane.f32.xlu1 %v34_v10  ;;  %29 = vadd.xlane.f32.xlu0 %v28_v11  ;;  %v31_v13 = vsel %vm27_vm0, %v20_v7, 0.0  ;;  %v40_v19 = vsel %vm27_vm0, %v23_v15, 0.0  ;;  %v25_v21 = vmul.f32 %v198_v17, %v198_v17  ;;  %v49_v22 = vsel %vm27_vm0, %v26_v20, 0.0 }
   0x6   :  { %v43_v18 = vsel %vm27_vm0, %v24_v14, 0.0 }
   0x7   :  { %v46_v23 = vsel %vm27_vm0, %v25_v21, 0.0 }
   0x9   :  { %38 = vadd.xlane.f32.xlu1 %v37_v12  ;;  %32 = vadd.xlane.f32.xlu0 %v31_v13 }
   0xd   :  { %44 = vadd.xlane.f32.xlu1 %v43_v18  ;;  %41 = vadd.xlane.f32.xlu0 %v40_v19 }
  0x11   :  { %50 = vadd.xlane.f32.xlu1 %v49_v22  ;;  %47 = vadd.xlane.f32.xlu0 %v46_v23 }
  0x8e   :  { %v36_v24 = vpop.xlane.xlu1 %35  ;;  %v30_v25 = vpop.xlane.xlu0 %29 }
  0x8f   :  { %v55_v26 = vmul.f32 0.03125, %v36_v24  ;;  %v53_v27 = vmul.f32 0.03125, %v30_v25 }
  0x91   :  { %v63_v28 = vadd.f32 1e-06, %v55_v26  ;;  %v61_v29 = vadd.f32 1e-06, %v53_v27 }
  0x92   :  { %v39_v30 = vpop.xlane.xlu1 %38  ;;  %v33_v31 = vpop.xlane.xlu0 %32 }
  0x93   :  { %113 = vrsqrt.f32 %v63_v28  ;;  %v56_v32 = vmul.f32 0.03125, %v39_v30  ;;  %v54_v33 = vmul.f32 0.03125, %v33_v31 }
  0x94   :  { %115 = vrsqrt.f32 %v61_v29 }
  0x95   :  { %v64_v34 = vadd.f32 1e-06, %v56_v32  ;;  %v62_v35 = vadd.f32 1e-06, %v54_v33 }
  0x96   :  { %v45_v36 = vpop.xlane.xlu1 %44  ;;  %v42_v37 = vpop.xlane.xlu0 %41 }
  0x97   :  { %117 = vrsqrt.f32 %v64_v34  ;;  %v58_v38 = vmul.f32 0.03125, %v45_v36  ;;  %v57_v39 = vmul.f32 0.03125, %v42_v37 }
  0x98   :  { %119 = vrsqrt.f32 %v62_v35 }
  0x99   :  { %v66_v40 = vadd.f32 1e-06, %v58_v38  ;;  %v65_v41 = vadd.f32 1e-06, %v57_v39 }
  0x9a   :  { %v51_v42 = vpop.xlane.xlu1 %50  ;;  %v48_v43 = vpop.xlane.xlu0 %47 }
  0x9b   :  { %121 = vrsqrt.f32 %v66_v40  ;;  %v60_v44 = vmul.f32 0.03125, %v51_v42  ;;  %v59_v45 = vmul.f32 0.03125, %v48_v43 }
  0x9c   :  { %123 = vrsqrt.f32 %v65_v41 }
  0x9d   :  { %v68_v46 = vadd.f32 1e-06, %v60_v44  ;;  %v67_v47 = vadd.f32 1e-06, %v59_v45 }
  0x9f   :  { %125 = vrsqrt.f32 %v68_v46 }
  0xa0   :  { %v114_v48 = vpop.eup %113  ;;  %127 = vrsqrt.f32 %v67_v47 }
  0xa1   :  { %v116_v50 = vpop.eup %115  ;;  %v79_v51 = vmul.f32 %v114_v48, %v147_v0 }
  0xa2   :  { %v77_v52 = vmul.f32 %v116_v50, %v152_v1 }
  0xa3   :  { %v94_v53 = vmul.f32 %v112_v49, %v79_v51 }
  0xa4   :  { %v118_v54 = vpop.eup %117  ;;  %v92_v55 = vmul.f32 %v112_v49, %v77_v52 }
  0xa5   :  { %v120_v56 = vpop.eup %119  ;;  %102 = vst.msk [vmem:[%s253_s2 + $0x10] sm:$0xff] %vm27_vm0, %v94_v53  ;;  %v80_v57 = vmul.f32 %v118_v54, %v157_v2 }
  0xa6   :  { %100 = vst.msk [vmem:[%s253_s2] sm:$0xff] %vm27_vm0, %v92_v55  ;;  %v78_v58 = vmul.f32 %v120_v56, %v168_v6 }
  0xa7   :  { %v95_v59 = vmul.f32 %v112_v49, %v80_v57 }
  0xa8   :  { %v122_v60 = vpop.eup %121  ;;  %v93_v61 = vmul.f32 %v112_v49, %v78_v58 }
  0xa9   :  { %v124_v62 = vpop.eup %123  ;;  %103 = vst.msk [vmem:[%s253_s2 + $0x18] sm:$0xff] %vm27_vm0, %v95_v59  ;;  %v82_v63 = vmul.f32 %v122_v60, %v175_v8 }
  0xaa   :  { %101 = vst.msk [vmem:[%s253_s2 + $0x8] sm:$0xff] %vm27_vm0, %v93_v61  ;;  %v81_v0 = vmul.f32 %v124_v62, %v180_v9 }
  0xab   :  { %v97_v1 = vmul.f32 %v112_v49, %v82_v63 }
  0xac   :  { %v126_v2 = vpop.eup %125  ;;  %v96_v3 = vmul.f32 %v112_v49, %v81_v0 }
  0xad   :  { %v128_v4 = vpop.eup %127  ;;  %105 = vst.msk [vmem:[%s253_s2 + $0x28] sm:$0xff] %vm27_vm0, %v97_v1  ;;  %v84_v5 = vmul.f32 %v126_v2, %v193_v16 }
  0xae   :  { %104 = vst.msk [vmem:[%s253_s2 + $0x20] sm:$0xff] %vm27_vm0, %v96_v3  ;;  %v83_v6 = vmul.f32 %v128_v4, %v198_v17 }
  0xaf   :  { %v99_v7 = vmul.f32 %v112_v49, %v84_v5 }
  0xb0   :  { %v98_v8 = vmul.f32 %v112_v49, %v83_v6 }
  0xb1   :  { %107 = vst.msk [vmem:[%s253_s2 + $0x38] sm:$0xff] %vm27_vm0, %v99_v7 }
  0xb2   :  { %106 = vst.msk [vmem:[%s253_s2 + $0x30] sm:$0xff] %vm27_vm0, %v98_v8 }

</bundles_post_ra>
